<compile_context>
chip_gen: v5e
topology: v5e:2x2
jax: 0.10.0
libtpu: 0.0.40
codegen_flags: <defaults>
</compile_context>

<pallas_src>
import jax
import jax.numpy as jnp
import numpy as np
from jax.experimental import pallas as pl
from jax.experimental.pallas import tpu as pltpu


def prototype_kernel(x_ref, w1_ref, b1_ref, w2_ref, b2_ref,
                     pt_ref, p2_ref, min_ref):
    nb = min_ref.shape[0]              # samples in this block
    s = x_ref.shape[0] // nb           # spatial positions per sample (multiple of 8)

    x = x_ref[...]                                                          # (nb*s, Cin) bf16

    # add_on_layers: 1x1 conv -> ReLU -> 1x1 conv -> Sigmoid (token-major matmuls).
    # bf16 MXU operands, f32 accumulation; elementwise math stays f32.
    h1 = jnp.dot(x, w1_ref[...], preferred_element_type=jnp.float32) + b1_ref[...]
    h1 = jnp.maximum(h1, 0.0)
    h2 = jnp.dot(h1.astype(jnp.bfloat16), w2_ref[...],
                 preferred_element_type=jnp.float32) + b2_ref[...]
    h2 = jax.nn.sigmoid(h2)                                                 # (nb*s, D) f32

    # _l2_convolution with 1x1 prototype filters (prototype dim padded to 128 lanes).
    xp = jnp.dot(h2.astype(jnp.bfloat16), pt_ref[...],
                 preferred_element_type=jnp.float32)                        # (nb*s, P_pad)
    # TODO(synk): at production S/P, move this cross-lane sum onto the MXU
    # (jnp.dot(h2*h2, ones(D,1))) if the XLU becomes the saturated slot.
    x2_patch_sum = jnp.sum(h2 * h2, axis=-1, keepdims=True)                 # (nb*s, 1)
    dist = jnp.maximum(x2_patch_sum - 2.0 * xp + p2_ref[...], 0.0)          # (nb*s, P_pad)

    # Global min-pool over each sample's spatial positions: one sublane reduction and
    # one unmasked full-block store (no per-row masked vst.msk, no Python unroll).
    min_ref[...] = jnp.min(dist.reshape(nb, s, dist.shape[-1]), axis=1)


def _round_up(x, m):
    return (x + m - 1) // m * m


def prototype_layer_forward(x_nchw, params):
    """Returns (logits (N, num_classes), min_distances (N, num_prototypes))."""
    w1, b1, w2, b2, proto, wl, bl = params
    N, Cin, H, W = x_nchw.shape
    S = H * W
    D = w1.shape[1]
    P = proto.shape[0]
    # Lane-dense prototype dimension. TODO(synk): round to a multiple of 256 at
    # production P on v6e/v7x (2x256^2 MXU); 128 is already ideal for v5e.
    P_pad = max(128, _round_up(P, 128))

    # Whole samples per grid block keeps the per-sample min-pool block-local (no
    # accumulator needed).  Toy shapes -> one block; at production sizes shrink this
    # so the token block fits VMEM and the 'parallel' axis shards across v7x cores.
    spb = N
    grid = (N // spb,)

    # NCHW -> token-major (N*S, Cin), cast to bf16 for the MXU (half the DMA bytes).
    # allow_input_fusion below lets XLA fuse this transpose/reshape/cast into the
    # pallas_call's input fetch instead of a separate HBM round trip.
    x_tok = jnp.transpose(x_nchw, (0, 2, 3, 1)).reshape(N * S, Cin).astype(jnp.bfloat16)

    w1b = w1.astype(jnp.bfloat16)
    w2b = w2.astype(jnp.bfloat16)
    # Lane-dense prototype tensors: zero-pad prototypes^T; pad sum(p^2) with +1e30
    # (padded prototype columns are sliced off below before any cross-prototype op).
    pt_pad = jnp.zeros((D, P_pad), jnp.bfloat16).at[:, :P].set(
        proto.T.astype(jnp.bfloat16))
    p2_pad = jnp.full((1, P_pad), 1e30, jnp.float32).at[0, :P].set(
        jnp.sum(proto * proto, axis=1))

    grid_spec = pltpu.PrefetchScalarGridSpec(
        num_scalar_prefetch=0,
        grid=grid,
        in_specs=[
            pl.BlockSpec((spb * S, Cin), lambda i: (i, 0)),   # streamed token block
            pl.BlockSpec((Cin, D), lambda i: (0, 0)),         # conv1 weight (in, out)
            pl.BlockSpec((1, D), lambda i: (0, 0)),            # conv1 bias (f32)
            pl.BlockSpec((D, D), lambda i: (0, 0)),             # conv2 weight
            pl.BlockSpec((1, D), lambda i: (0, 0)),              # conv2 bias (f32)
            pl.BlockSpec((D, P_pad), lambda i: (0, 0)),           # prototypes^T (padded)
            pl.BlockSpec((1, P_pad), lambda i: (0, 0)),            # sum(prototypes^2)
        ],
        out_specs=pl.BlockSpec((spb, P_pad), lambda i: (i, 0)),    # min_distances
    )

    tokens = N * S
    cost = pl.CostEstimate(
        flops=int(2 * tokens * (Cin * D + D * D + D * P_pad)
                  + 8 * tokens * P_pad + 4 * tokens * D),
        transcendentals=int(tokens * D),                 # sigmoid ~ one exp per element
        bytes_accessed=int(tokens * Cin * 2              # x (bf16)
                           + (Cin * D + D * D + D * P_pad) * 2   # weights (bf16)
                           + (D + D + P_pad) * 4         # biases / p2 (f32)
                           + N * P_pad * 4),             # output (f32)
    )

    min_pad = pl.pallas_call(
        prototype_kernel,
        out_shape=jax.ShapeDtypeStruct((N, P_pad), jnp.float32),
        grid_spec=grid_spec,
        compiler_params=pltpu.CompilerParams(
            dimension_semantics=("parallel",),
            allow_input_fusion=[True, False, False, False, False, False, False],
            vmem_limit_bytes=64 * 1024 * 1024,
        ),
        cost_estimate=cost,
    )(x_tok, w1b, b1, w2b, b2, pt_pad, p2_pad)

    min_d = min_pad[:, :P]                    # drop padded prototype lanes
    # Last linear layer hoisted out of the kernel (paf='linear': activation = -dist).
    logits = (-min_d) @ wl + bl
    return logits, min_d


def reference_forward(x_nchw, params, mixed_precision=True):
    """Pure-JAX reference mirroring the PyTorch module.

    With mixed_precision=True it applies the same bf16-operand / f32-accumulate
    recipe as the kernel (for tight numerical comparison); with False it is the
    straight f32 module semantics.
    """
    w1, b1, w2, b2, proto, wl, bl = params
    N, Cin, H, W = x_nchw.shape
    S = H * W
    cast = (lambda a: a.astype(jnp.bfloat16)) if mixed_precision else (lambda a: a)
    x = jnp.transpose(x_nchw, (0, 2, 3, 1)).reshape(N * S, Cin)
    h1 = jnp.maximum(jnp.dot(cast(x), cast(w1),
                             preferred_element_type=jnp.float32) + b1, 0.0)
    h2 = jax.nn.sigmoid(jnp.dot(cast(h1), cast(w2),
                                preferred_element_type=jnp.float32) + b2)
    xp = jnp.dot(cast(h2), cast(proto.T), preferred_element_type=jnp.float32)
    x2 = jnp.sum(h2 * h2, axis=-1, keepdims=True)
    p2 = jnp.sum(proto * proto, axis=1)[None, :]
    dist = jnp.maximum(x2 - 2.0 * xp + p2, 0.0).reshape(N, S, -1)
    min_d = jnp.min(dist, axis=1)
    logits = (-min_d) @ wl + bl
    return logits, min_d


if __name__ == "__main__":
    # Small, module-consistent shapes:
    #   falc (backbone channels) = 64, prototype_shape = (10, 32, 1, 1),
    #   num_classes = 2 (10 % 2 == 0), batch = 2, spatial = 8x8.
    N, FALC, H, W = 2, 64, 8, 8
    NUM_PROTOTYPES, PROTO_DIM = 10, 32
    NUM_CLASSES = 2

    key = jax.random.PRNGKey(0)
    k = jax.random.split(key, 8)

    x = jax.random.normal(k[0], (N, FALC, H, W), dtype=jnp.float32)

    # add_on_layers params (PyTorch Conv2d weight is (out,in,1,1); stored here as (in,out))
    w1 = 0.1 * jax.random.normal(k[1], (FALC, PROTO_DIM), dtype=jnp.float32)
    b1 = 0.1 * jax.random.normal(k[2], (1, PROTO_DIM), dtype=jnp.float32)
    w2 = 0.1 * jax.random.normal(k[3], (PROTO_DIM, PROTO_DIM), dtype=jnp.float32)
    b2 = 0.1 * jax.random.normal(k[4], (1, PROTO_DIM), dtype=jnp.float32)

    # prototypes ~ U[0,1) with shape (P, D, 1, 1) -> stored squeezed as (P, D)
    prototypes = jax.random.uniform(k[5], (NUM_PROTOTYPES, PROTO_DIM),
                                    dtype=jnp.float32)

    # last linear layer: PyTorch weight (C, P), bias (C,) -> (P, C), (1, C)
    wl = 0.1 * jax.random.normal(k[6], (NUM_PROTOTYPES, NUM_CLASSES), dtype=jnp.float32)
    bl = 0.1 * jax.random.normal(k[7], (1, NUM_CLASSES), dtype=jnp.float32)

    params = (w1, b1, w2, b2, prototypes, wl, bl)

    forward = jax.jit(prototype_layer_forward)
    logits, min_d = forward(x, params)
    jax.block_until_ready((logits, min_d))

    # Tight check against a reference using the identical bf16/f32 mixed precision.
    ref_logits, ref_min_d = reference_forward(x, params, mixed_precision=True)
    np.testing.assert_allclose(np.asarray(logits), np.asarray(ref_logits),
                               rtol=1e-3, atol=1e-3)
    np.testing.assert_allclose(np.asarray(min_d), np.asarray(ref_min_d),
                               rtol=1e-3, atol=1e-3)

    # Loose check against the pure-f32 module semantics (bf16 MXU operands only).
    f32_logits, f32_min_d = reference_forward(x, params, mixed_precision=False)
    np.testing.assert_allclose(np.asarray(logits), np.asarray(f32_logits),
                               rtol=1e-1, atol=1e-1)
    np.testing.assert_allclose(np.asarray(min_d), np.asarray(f32_min_d),
                               rtol=1e-1, atol=1e-1)

    assert logits.shape == (N, NUM_CLASSES) and min_d.shape == (N, NUM_PROTOTYPES)
    print("KERNEL_OK")
</pallas_src>

<mosaic_0001>
module attributes {stable_mosaic.version = 11 : i64} {
  func.func @prototype_kernel(%arg0: i32, %arg1: memref<128x64xbf16, #tpu.memory_space<vmem>>, %arg2: memref<64x32xbf16, #tpu.memory_space<vmem>>, %arg3: memref<1x32xf32, #tpu.memory_space<vmem>>, %arg4: memref<32x32xbf16, #tpu.memory_space<vmem>>, %arg5: memref<1x32xf32, #tpu.memory_space<vmem>>, %arg6: memref<32x128xbf16, #tpu.memory_space<vmem>>, %arg7: memref<1x128xf32, #tpu.memory_space<vmem>>, %arg8: memref<2x128xf32, #tpu.memory_space<vmem>>) attributes {dimension_semantics = [#tpu.dimension_semantics<parallel>], iteration_bounds = array<i64: 1>, scalar_prefetch = 0 : i64, scratch_operands = 0 : i64, tpu.core_type = #tpu.core_type<tc>, window_params = [{transform_indices = @transform_0, window_bounds = array<i64: 128, 64>}, {pipeline_mode = #tpu.pipeline_mode<synchronous>, transform_indices = @transform_1, window_bounds = array<i64: 64, 32>}, {pipeline_mode = #tpu.pipeline_mode<synchronous>, transform_indices = @transform_2, window_bounds = array<i64: 1, 32>}, {pipeline_mode = #tpu.pipeline_mode<synchronous>, transform_indices = @transform_3, window_bounds = array<i64: 32, 32>}, {pipeline_mode = #tpu.pipeline_mode<synchronous>, transform_indices = @transform_4, window_bounds = array<i64: 1, 32>}, {pipeline_mode = #tpu.pipeline_mode<synchronous>, transform_indices = @transform_5, window_bounds = array<i64: 32, 128>}, {pipeline_mode = #tpu.pipeline_mode<synchronous>, transform_indices = @transform_6, window_bounds = array<i64: 1, 128>}, {transform_indices = @transform_7, window_bounds = array<i64: 2, 128>}]} {
    %c0 = arith.constant 0 : index
    %c0_0 = arith.constant 0 : index
    %0 = vector.load %arg1[%c0, %c0_0] : memref<128x64xbf16, #tpu.memory_space<vmem>>, vector<128x64xbf16>
    %c0_1 = arith.constant 0 : index
    %c0_2 = arith.constant 0 : index
    %1 = vector.load %arg2[%c0_1, %c0_2] : memref<64x32xbf16, #tpu.memory_space<vmem>>, vector<64x32xbf16>
    %cst = arith.constant dense<0.000000e+00> : vector<128x32xf32>
    %2 = tpu.matmul %0, %1, %cst {dimension_numbers = #tpu.dot_dimension_numbers<[1], [0], [0], [1], [0, 0, 1, 1], [], []>} : vector<128x64xbf16>, vector<64x32xbf16>, vector<128x32xf32> -> vector<128x32xf32>
    %c0_3 = arith.constant 0 : index
    %c0_4 = arith.constant 0 : index
    %3 = vector.load %arg3[%c0_3, %c0_4] : memref<1x32xf32, #tpu.memory_space<vmem>>, vector<1x32xf32>
    %4 = vector.broadcast %3 : vector<1x32xf32> to vector<128x32xf32>
    %5 = arith.addf %2, %4 : vector<128x32xf32>
    %cst_5 = arith.constant 0.000000e+00 : f32
    %6 = vector.broadcast %cst_5 : f32 to vector<128x32xf32>
    %7 = arith.maximumf %5, %6 : vector<128x32xf32>
    %8 = arith.truncf %7 : vector<128x32xf32> to vector<128x32xbf16>
    %c0_6 = arith.constant 0 : index
    %c0_7 = arith.constant 0 : index
    %9 = vector.load %arg4[%c0_6, %c0_7] : memref<32x32xbf16, #tpu.memory_space<vmem>>, vector<32x32xbf16>
    %cst_8 = arith.constant dense<0.000000e+00> : vector<128x32xf32>
    %10 = tpu.matmul %8, %9, %cst_8 {dimension_numbers = #tpu.dot_dimension_numbers<[1], [0], [0], [1], [0, 0, 1, 1], [], []>} : vector<128x32xbf16>, vector<32x32xbf16>, vector<128x32xf32> -> vector<128x32xf32>
    %c0_9 = arith.constant 0 : index
    %c0_10 = arith.constant 0 : index
    %11 = vector.load %arg5[%c0_9, %c0_10] : memref<1x32xf32, #tpu.memory_space<vmem>>, vector<1x32xf32>
    %12 = vector.broadcast %11 : vector<1x32xf32> to vector<128x32xf32>
    %13 = arith.addf %10, %12 : vector<128x32xf32>
    %14 = arith.negf %13 : vector<128x32xf32>
    %15 = math.exp %14 : vector<128x32xf32>
    %cst_11 = arith.constant 1.000000e+00 : f32
    %16 = vector.broadcast %cst_11 : f32 to vector<128x32xf32>
    %17 = arith.addf %16, %15 : vector<128x32xf32>
    %18 = arith.divf %16, %17 : vector<128x32xf32>
    %19 = arith.truncf %18 : vector<128x32xf32> to vector<128x32xbf16>
    %c0_12 = arith.constant 0 : index
    %c0_13 = arith.constant 0 : index
    %20 = vector.load %arg6[%c0_12, %c0_13] : memref<32x128xbf16, #tpu.memory_space<vmem>>, vector<32x128xbf16>
    %cst_14 = arith.constant dense<0.000000e+00> : vector<128x128xf32>
    %21 = tpu.matmul %19, %20, %cst_14 {dimension_numbers = #tpu.dot_dimension_numbers<[1], [0], [0], [1], [0, 0, 1, 1], [], []>} : vector<128x32xbf16>, vector<32x128xbf16>, vector<128x128xf32> -> vector<128x128xf32>
    %22 = arith.mulf %18, %18 : vector<128x32xf32>
    %cst_15 = arith.constant dense<0.000000e+00> : vector<128xf32>
    %23 = vector.multi_reduction <add>, %22, %cst_15 [1] : vector<128x32xf32> to vector<128xf32>
    %24 = vector.shape_cast %23 : vector<128xf32> to vector<128x1xf32>
    %cst_16 = arith.constant 2.000000e+00 : f32
    %25 = vector.broadcast %cst_16 : f32 to vector<128x128xf32>
    %26 = arith.mulf %25, %21 : vector<128x128xf32>
    %27 = vector.broadcast %24 : vector<128x1xf32> to vector<128x128xf32>
    %28 = arith.subf %27, %26 : vector<128x128xf32>
    %c0_17 = arith.constant 0 : index
    %c0_18 = arith.constant 0 : index
    %29 = vector.load %arg7[%c0_17, %c0_18] : memref<1x128xf32, #tpu.memory_space<vmem>>, vector<1x128xf32>
    %30 = vector.broadcast %29 : vector<1x128xf32> to vector<128x128xf32>
    %31 = arith.addf %28, %30 : vector<128x128xf32>
    %cst_19 = arith.constant 0.000000e+00 : f32
    %32 = vector.broadcast %cst_19 : f32 to vector<128x128xf32>
    %33 = arith.maximumf %31, %32 : vector<128x128xf32>
    %34 = vector.shape_cast %33 : vector<128x128xf32> to vector<2x64x128xf32>
    %cst_20 = arith.constant dense<0x7F800000> : vector<2x128xf32>
    %35 = vector.multi_reduction <minimumf>, %34, %cst_20 [1] : vector<2x64x128xf32> to vector<2x128xf32>
    %c0_21 = arith.constant 0 : index
    %c0_22 = arith.constant 0 : index
    %36 = vector.load %arg8[%c0_21, %c0_22] : memref<2x128xf32, #tpu.memory_space<vmem>>, vector<2x128xf32>
    tpu.vector_store %arg8[%c0_21, %c0_22], %35 {strides = array<i32>} : memref<2x128xf32, #tpu.memory_space<vmem>>, vector<2x128xf32>,
    return
  }
  func.func @transform_0(%arg0: i32) -> (i32, i32) {
    %c0_i32 = arith.constant 0 : i32
    %c0_i32_0 = arith.constant 0 : i32
    return %arg0, %c0_i32 : i32, i32
  }
  func.func @transform_1(%arg0: i32) -> (i32, i32) {
    %c0_i32 = arith.constant 0 : i32
    %c0_i32_0 = arith.constant 0 : i32
    %c0_i32_1 = arith.constant 0 : i32
    return %c0_i32, %c0_i32_0 : i32, i32
  }
  func.func @transform_2(%arg0: i32) -> (i32, i32) {
    %c0_i32 = arith.constant 0 : i32
    %c0_i32_0 = arith.constant 0 : i32
    %c0_i32_1 = arith.constant 0 : i32
    return %c0_i32, %c0_i32_0 : i32, i32
  }
  func.func @transform_3(%arg0: i32) -> (i32, i32) {
    %c0_i32 = arith.constant 0 : i32
    %c0_i32_0 = arith.constant 0 : i32
    %c0_i32_1 = arith.constant 0 : i32
    return %c0_i32, %c0_i32_0 : i32, i32
  }
  func.func @transform_4(%arg0: i32) -> (i32, i32) {
    %c0_i32 = arith.constant 0 : i32
    %c0_i32_0 = arith.constant 0 : i32
    %c0_i32_1 = arith.constant 0 : i32
    return %c0_i32, %c0_i32_0 : i32, i32
  }
  func.func @transform_5(%arg0: i32) -> (i32, i32) {
    %c0_i32 = arith.constant 0 : i32
    %c0_i32_0 = arith.constant 0 : i32
    %c0_i32_1 = arith.constant 0 : i32
    return %c0_i32, %c0_i32_0 : i32, i32
  }
  func.func @transform_6(%arg0: i32) -> (i32, i32) {
    %c0_i32 = arith.constant 0 : i32
    %c0_i32_0 = arith.constant 0 : i32
    %c0_i32_1 = arith.constant 0 : i32
    return %c0_i32, %c0_i32_0 : i32, i32
  }
  func.func @transform_7(%arg0: i32) -> (i32, i32) {
    %c0_i32 = arith.constant 0 : i32
    %c0_i32_0 = arith.constant 0 : i32
    return %arg0, %c0_i32 : i32, i32
  }
}

</mosaic_0001>

<bundles_post_ra>
// kernel: prototype_layer_forward.1
= control target key start
LH: loop header
LB: loop body
LE: loop exit
PB: predicated region body
PF: predicated region fallthrough
CT: control target
= control target key end

     0   :  { %vm119_vm0 = vcmask 523264   ;;  %vm237_vm1 = vcmask 261120   ;;  %s1364_s1 = inlined_call_operand.vmem [shape: bf16[64,32], index: 1, kind: input, shape index: {}]   ;;  %s1365_s2 = inlined_call_operand.vmem [shape: f32[1,32], index: 2, kind: input, shape index: {}]   ;;  %s1366_s0 = inlined_call_operand.vmem [shape: bf16[128,64], index: 0, kind: input, shape index: {}]   ;;  %s1367_s3 = inlined_call_operand.vmem [shape: bf16[32,32], index: 3, kind: input, shape index: {}]   ;;  %s1368_s4 = inlined_call_operand.vmem [shape: f32[1,32], index: 4, kind: input, shape index: {}]   ;;  %s1369_s5 = inlined_call_operand.vmem [shape: bf16[32,128], index: 5, kind: input, shape index: {}]   ;;  %s1370_s6 = inlined_call_operand.vmem [shape: f32[1,128], index: 6, kind: input, shape index: {}]   ;;  %s1371_s7 = inlined_call_operand.vmem [shape: f32[2,128], index: 7, kind: output, shape index: {}]  }
   0x1   :  { %v995_v0 = vld [vmem:[%s1364_s1 + $0x18] sm:$0xff]  ;;  %v994_v1 = vld [vmem:[%s1364_s1 + $0x10] sm:$0xff]  ;;  %v993_v2 = vld [vmem:[%s1364_s1 + $0x8] sm:$0xff] }
   0x2   :  { %148 = vmatpush.bf16.msra.mxu0 %v995_v0  ;;  %1000 = vmatpush.bf16.msra.mxu3 %v995_v0  ;;  %v992_v3 = vld [vmem:[%s1364_s1] sm:$0xff]  ;;  %v990_v5 = vld [vmem:[%s1366_s0 + $0x30] sm:$0xff]  ;;  %v985_v6 = vld [vmem:[%s1366_s0 + $0x8] sm:$0xff] }
   0x3   :  { %v984_v4 = vld [vmem:[%s1366_s0] sm:$0xff]  ;;  %v991_v7 = vld [vmem:[%s1366_s0 + $0x38] sm:$0xff]  ;;  %v986_v8 = vld [vmem:[%s1366_s0 + $0x10] sm:$0xff] }
   0x4   :  { %v987_v9 = vld [vmem:[%s1366_s0 + $0x18] sm:$0xff]  ;;  %v988_v10 = vld [vmem:[%s1366_s0 + $0x20] sm:$0xff]  ;;  %v989_v11 = vld [vmem:[%s1366_s0 + $0x28] sm:$0xff] }
   0x5   :  { %v997_v12 = vld [vmem:[%s1367_s3 + $0x8] sm:$0xff]  ;;  %v996_v13 = vld [vmem:[%s1367_s3] sm:$0xff] }
   0x6   :  { %149 = vmatpush.bf16.msra.mxu0 %v994_v1  ;;  %1001 = vmatpush.bf16.msra.mxu3 %v994_v1  ;;  %v1008_v15 = vld [vmem:[%s1365_s2] ss:$0 sm:$0xff] }
   0x7   :  { %268 = vmatpush.bf16.msra.mxu1 %v997_v12 }
   0xa   :  { %150 = vmatpush.bf16.msra.mxu0 %v993_v2  ;;  %1002 = vmatpush.bf16.msra.mxu3 %v993_v2 }
   0xb   :  { %269 = vmatpush.bf16.msra.mxu1 %v996_v13 }
   0xe   :  { %151 = vmatpush.bf16.msra.mxu0 %v992_v3  ;;  %1003 = vmatpush.bf16.msra.mxu3 %v992_v3 }
  0x11   :  { %928 = vmatmul.msk.bf16.vlgmr.msra.gmra.mxu0 %vm119_vm0, %v984_v4  ;;  %934 = vmatmul.msk.bf16.vlgmr.msra.gmra.mxu3 %vm119_vm0, %v990_v5 }
  0x12   :  { %1004 = vmatpush.bf16.msrb.mxu3 %v997_v12  ;;  %v998_v12 = vld [vmem:[%s1369_s5] sm:$0xff] }
  0x16   :  { %1005 = vmatpush.bf16.msrb.mxu3 %v996_v13 }
  0x21   :  { %929 = vmatmul.msk.bf16.gmra.mxu0 %vm119_vm0, %v985_v6  ;;  %935 = vmatmul.msk.bf16.gmra.mxu3 %vm119_vm0, %v991_v7  ;;  %v1171_v7 = vld [vmem:[%s1368_s4] ss:$0 sm:$0xff] }
  0x31   :  { %930 = vmatmul.msk.bf16.gmra.mxu0 %vm119_vm0, %v986_v8 }
  0x41   :  { %931 = vmatmul.msk.bf16.gmra.mxu0 %vm119_vm0, %v987_v9  ;;  %v999_v9 = vld [vmem:[%s1369_s5 + $0x8] sm:$0xff] }
  0x42   :  { %669 = vmatpush.bf16.msra.mxu2 %v999_v9  ;;  %1006 = vmatpush.bf16.msra.mxu3 %v999_v9 }
  0x46   :  { %670 = vmatpush.bf16.msra.mxu2 %v998_v12  ;;  %1007 = vmatpush.bf16.msra.mxu3 %v998_v12 }
  0x51   :  { %932 = vmatmul.msk.bf16.gmra.mxu0 %vm119_vm0, %v988_v10 }
  0x61   :  { %933 = vmatmul.msk.bf16.gmra.mxu0 %vm119_vm0, %v989_v11 }
  0x8e   :  { %v153_v14 = vpop.f32.mrf.mxu0 }
  0x8f   :  { %v154_v17 = vadd.f32 %v1008_v15, %v153_v14 }
  0x91   :  { %v193_v20 = vmax.f32 %v154_v17, 0.0 }
  0x94   :  { %v183_v16 = vpop.f32.mrf.mxu3 }
  0x95   :  { %v184_v22 = vadd.f32 %v1008_v15, %v183_v16 }
  0x96   :  { %v155_v18 = vpop.f32.mrf.mxu0 }
  0x97   :  { %v156_v19 = vadd.f32 %v1008_v15, %v155_v18  ;;  %v205_v25 = vmax.f32 %v184_v22, 0.0 }
  0x99   :  { %v194_v21 = vmax.f32 %v156_v19, 0.0 }
  0x9b   :  { %v209_v23 = vpack.c.bf16 %v194_v21, %v193_v20 }
  0x9c   :  { %v185_v24 = vpop.f32.mrf.mxu3 }
  0x9d   :  { %944 = vmatmul.msk.bf16.vlgmr.msra.gmra.mxu1 %vm237_vm1, %v209_v23  ;;  %v186_v26 = vadd.f32 %v1008_v15, %v185_v24 }
  0x9e   :  { %v158_v27 = vpop.f32.mrf.mxu0 }
  0x9f   :  { %v206_v28 = vmax.f32 %v186_v26, 0.0  ;;  %v159_v31 = vadd.f32 %v1008_v15, %v158_v27 }
  0xa1   :  { %v215_v29 = vpack.c.bf16 %v206_v28, %v205_v25  ;;  %v195_v34 = vmax.f32 %v159_v31, 0.0 }
  0xa4   :  { %v188_v30 = vpop.f32.mrf.mxu3 }
  0xa5   :  { %v189_v36 = vadd.f32 %v1008_v15, %v188_v30 }
  0xa6   :  { %v160_v32 = vpop.f32.mrf.mxu0 }
  0xa7   :  { %v161_v33 = vadd.f32 %v1008_v15, %v160_v32  ;;  %v207_v39 = vmax.f32 %v189_v36, 0.0 }
  0xa9   :  { %v196_v35 = vmax.f32 %v161_v33, 0.0 }
  0xab   :  { %v210_v37 = vpack.c.bf16 %v196_v35, %v195_v34 }
  0xac   :  { %v190_v38 = vpop.f32.mrf.mxu3 }
  0xad   :  { %945 = vmatmul.msk.bf16.gmra.mxu1 %vm237_vm1, %v210_v37  ;;  %v191_v40 = vadd.f32 %v1008_v15, %v190_v38 }
  0xae   :  { %v163_v41 = vpop.f32.mrf.mxu0 }
  0xaf   :  { %v208_v42 = vmax.f32 %v191_v40, 0.0  ;;  %v164_v44 = vadd.f32 %v1008_v15, %v163_v41 }
  0xb1   :  { %v216_v43 = vpack.c.bf16 %v208_v42, %v207_v39  ;;  %v197_v47 = vmax.f32 %v164_v44, 0.0 }
  0xb3   :  { %951 = vmatmul.msk.bf16.vlgmr.msrb.gmra.mxu3 %vm237_vm1, %v216_v43 }
  0xb6   :  { %v165_v45 = vpop.f32.mrf.mxu0 }
  0xb7   :  { %v166_v46 = vadd.f32 %v1008_v15, %v165_v45 }
  0xb9   :  { %v198_v48 = vmax.f32 %v166_v46, 0.0 }
  0xbb   :  { %v211_v49 = vpack.c.bf16 %v198_v48, %v197_v47 }
  0xbd   :  { %946 = vmatmul.msk.bf16.gmra.mxu1 %vm237_vm1, %v211_v49 }
  0xbe   :  { %v168_v50 = vpop.f32.mrf.mxu0 }
  0xbf   :  { %v169_v51 = vadd.f32 %v1008_v15, %v168_v50 }
  0xc1   :  { %v199_v54 = vmax.f32 %v169_v51, 0.0 }
  0xc6   :  { %v170_v52 = vpop.f32.mrf.mxu0 }
  0xc7   :  { %v171_v53 = vadd.f32 %v1008_v15, %v170_v52 }
  0xc9   :  { %v200_v55 = vmax.f32 %v171_v53, 0.0 }
  0xcb   :  { %v212_v56 = vpack.c.bf16 %v200_v55, %v199_v54 }
  0xcd   :  { %947 = vmatmul.msk.bf16.gmra.mxu1 %vm237_vm1, %v212_v56 }
  0xce   :  { %v173_v57 = vpop.f32.mrf.mxu0 }
  0xcf   :  { %v174_v58 = vadd.f32 %v1008_v15, %v173_v57 }
  0xd1   :  { %v201_v61 = vmax.f32 %v174_v58, 0.0 }
  0xd6   :  { %v175_v59 = vpop.f32.mrf.mxu0 }
  0xd7   :  { %v176_v60 = vadd.f32 %v1008_v15, %v175_v59 }
  0xd9   :  { %v202_v62 = vmax.f32 %v176_v60, 0.0 }
  0xdb   :  { %v213_v63 = vpack.c.bf16 %v202_v62, %v201_v61 }
  0xdd   :  { %948 = vmatmul.msk.bf16.gmra.mxu1 %vm237_vm1, %v213_v63 }
  0xde   :  { %v178_v0 = vpop.f32.mrf.mxu0 }
  0xdf   :  { %v179_v1 = vadd.f32 %v1008_v15, %v178_v0 }
  0xe1   :  { %v203_v4 = vmax.f32 %v179_v1, 0.0 }
  0xe6   :  { %v180_v2 = vpop.f32.mrf.mxu0 }
  0xe7   :  { %v181_v3 = vadd.f32 %v1008_v15, %v180_v2 }
  0xe9   :  { %v204_v5 = vmax.f32 %v181_v3, 0.0 }
  0xeb   :  { %v214_v6 = vpack.c.bf16 %v204_v5, %v203_v4 }
  0xed   :  { %949 = vmatmul.msk.bf16.gmra.mxu1 %vm237_vm1, %v214_v6 }
  0xfd   :  { %950 = vmatmul.msk.bf16.gmra.mxu1 %vm237_vm1, %v215_v29 }
 0x11a   :  { %v271_v8 = vpop.f32.mrf.mxu1 }
 0x11b   :  { %v272_v10 = vadd.f32 %v1171_v7, %v271_v8 }
 0x11d   :  { %v952_v11 = vmul.f32 -1.442695, %v272_v10 }
 0x11f   :  { %1011 = vpow2.f32 %v952_v11 }
 0x122   :  { %v273_v13 = vpop.f32.mrf.mxu1 }
 0x123   :  { %v274_v14 = vadd.f32 %v1171_v7, %v273_v13 }
 0x125   :  { %v1012_v15 = vpop.eup %1011  ;;  %v953_v16 = vmul.f32 -1.442695, %v274_v14 }
 0x126   :  { %v359_v17 = vadd.f32 1.0, %v1012_v15 }
 0x127   :  { %1013 = vpow2.f32 %v953_v16 }
 0x128   :  { %1015 = vrcp.f32 %v359_v17  ;;  %v386_v27 = vand.u32 2147483648, %v359_v17  ;;  %v384_v30 = vand.u32 2147483647, %v359_v17  ;;  %vm380_vm3 = vweird.f32 %v359_v17 }
 0x12a   :  { %v276_v18 = vpop.f32.mrf.mxu1  ;;  %v387_v36 = vor.u32 1.1754944e-38, %v386_v27  ;;  %vm385_vm5 = vcmp.eq.f32.partialorder %v384_v30, 8.507059e+37 }
 0x12b   :  { %v277_v19 = vadd.f32 %v1171_v7, %v276_v18 }
 0x12d   :  { %v1014_v20 = vpop.eup %1013  ;;  %v954_v21 = vmul.f32 -1.442695, %v277_v19 }
 0x12e   :  { %v1016_v22 = vpop.eup %1015  ;;  %v360_v23 = vadd.f32 1.0, %v1014_v20 }
 0x12f   :  { %1017 = vpow2.f32 %v954_v21  ;;  %v376_v24 = vmul.f32 %v1016_v22, %v359_v17  ;;  %vm381_vm2 = vweird.f32 %v1016_v22 }
 0x130   :  { %1019 = vrcp.f32 %v360_v23  ;;  %vm382_vm4 = vmor %vm380_vm3, %vm381_vm2  ;;  %v399_v45 = vand.u32 2147483647, %v360_v23  ;;  %v401_v46 = vand.u32 2147483648, %v360_v23  ;;  %vm395_vm7 = vweird.f32 %v360_v23 }
 0x131   :  { %v377_v25 = vsub.f32 1.0, %v376_v24 }
 0x132   :  { %v278_v26 = vpop.f32.mrf.mxu1  ;;  %v402_v56 = vor.u32 1.1754944e-38, %v401_v46  ;;  %vm400_vm9 = vcmp.eq.f32.partialorder %v399_v45, 8.507059e+37 }
 0x133   :  { %v279_v28 = vadd.f32 %v1171_v7, %v278_v26  ;;  %v378_v29 = vmul.f32 %v1016_v22, %v377_v25 }
 0x135   :  { %v1018_v31 = vpop.eup %1017  ;;  %v955_v32 = vmul.f32 -1.442695, %v279_v28  ;;  %v379_v33 = vadd.f32 %v1016_v22, %v378_v29 }
 0x136   :  { %v1020_v34 = vpop.eup %1019  ;;  %v1183_v35 = vadd.f32 1.0, %v1018_v31  ;;  %v306_v37 = vpop.f32.mrf.mxu3 }
 0x137   :  { %v391_v38 = vmul.f32 %v1020_v34, %v360_v23  ;;  %1021 = vpow2.f32 %v955_v32  ;;  %v383_v39 = vsel %vm382_vm4, %v1016_v22, %v379_v33  ;;  %v307_v43 = vadd.f32 %v1171_v7, %v306_v37 }
 0x138   :  { %1023 = vrcp.f32 %v1183_v35  ;;  %v388_v40 = vsel %vm385_vm5, %v387_v36, %v383_v39  ;;  %vm396_vm6 = vweird.f32 %v1020_v34  ;;  %v414_v1 = vand.u32 2147483647, %v1183_v35 }
 0x139   :  { %v392_v41 = vsub.f32 1.0, %v391_v38  ;;  %v712_v42 = vmul.f32 %v388_v40, %v388_v40  ;;  %v966_v50 = vmul.f32 -1.442695, %v307_v43  ;;  %vm397_vm8 = vmor %vm395_vm7, %vm396_vm6  ;;  %v416_v2 = vand.u32 2147483648, %v1183_v35 }
 0x13a   :  { %v281_v44 = vpop.f32.mrf.mxu1  ;;  %vm410_vm11 = vweird.f32 %v1183_v35  ;;  %vm415_vm13 = vcmp.eq.f32.partialorder %v414_v1, 8.507059e+37 }
 0x13b   :  { %v282_v47 = vadd.f32 %v1171_v7, %v281_v44  ;;  %v393_v48 = vmul.f32 %v1020_v34, %v392_v41  ;;  %v728_v49 = vsel %vm237_vm1, %v712_v42, 0.0  ;;  %1025 = vpow2.f32 %v966_v50 }
 0x13c   :  { %729 = vadd.xlane.f32.xlu0 %v728_v49  ;;  %v417_v16 = vor.u32 1.1754944e-38, %v416_v2 }
 0x13d   :  { %v1022_v51 = vpop.eup %1021  ;;  %v956_v52 = vmul.f32 -1.442695, %v282_v47  ;;  %v394_v53 = vadd.f32 %v1020_v34, %v393_v48 }
 0x13e   :  { %v1024_v54 = vpop.eup %1023  ;;  %v1189_v55 = vadd.f32 1.0, %v1022_v51  ;;  %v308_v59 = vpop.f32.mrf.mxu3 }
 0x13f   :  { %1027 = vpow2.f32 %v956_v52  ;;  %v398_v57 = vsel %vm397_vm8, %v1020_v34, %v394_v53  ;;  %v406_v58 = vmul.f32 %v1024_v54, %v1183_v35  ;;  %v309_v3 = vadd.f32 %v1171_v7, %v308_v59 }
 0x140   :  { %1029 = vrcp.f32 %v1189_v55  ;;  %v403_v60 = vsel %vm400_vm9, %v402_v56, %v398_v57  ;;  %vm411_vm10 = vweird.f32 %v1024_v54  ;;  %v429_v23 = vand.u32 2147483647, %v1189_v55 }
 0x141   :  { %v615_v61 = vpack.c.bf16 %v403_v60, %v388_v40  ;;  %v713_v62 = vmul.f32 %v403_v60, %v403_v60  ;;  %v407_v63 = vsub.f32 1.0, %v406_v58  ;;  %v1026_v8 = vpop.eup %1025  ;;  %v967_v9 = vmul.f32 -1.442695, %v309_v3  ;;  %vm412_vm12 = vmor %vm410_vm11, %vm411_vm10 }
 0x142   :  { %v283_v0 = vpop.f32.mrf.mxu1  ;;  %v1200_v13 = vadd.f32 1.0, %v1026_v8  ;;  %v431_v24 = vand.u32 2147483648, %v1189_v55  ;;  %vm425_vm15 = vweird.f32 %v1189_v55  ;;  %vm430_vm2 = vcmp.eq.f32.partialorder %v429_v23, 8.507059e+37 }
 0x143   :  { %v284_v4 = vadd.f32 %v1171_v7, %v283_v0  ;;  %976 = vmatmul.msk.bf16.vlgmr.msra.gmra.mxu2 %vm237_vm1, %v615_v61  ;;  %v731_v5 = vsel %vm237_vm1, %v713_v62, 0.0  ;;  %v408_v6 = vmul.f32 %v1024_v54, %v407_v63  ;;  %1031 = vpow2.f32 %v967_v9 }
 0x144   :  { %732 = vadd.xlane.f32.xlu0 %v731_v5  ;;  %v432_v35 = vor.u32 1.1754944e-38, %v431_v24  ;;  %v596_v40 = vand.u32 2147483648, %v1200_v13  ;;  %vm590_vm3 = vweird.f32 %v1200_v13 }
 0x145   :  { %v1028_v10 = vpop.eup %1027  ;;  %v957_v11 = vmul.f32 -1.442695, %v284_v4  ;;  %v409_v12 = vadd.f32 %v1024_v54, %v408_v6 }
 0x146   :  { %v1030_v14 = vpop.eup %1029  ;;  %v1202_v15 = vadd.f32 1.0, %v1028_v10  ;;  %v1232_v53 = vor.u32 1.1754944e-38, %v596_v40 }
 0x147   :  { %v421_v17 = vmul.f32 %v1030_v14, %v1189_v55  ;;  %1033 = vpow2.f32 %v957_v11  ;;  %v413_v18 = vsel %vm412_vm12, %v1024_v54, %v409_v12  ;;  %vm426_vm14 = vweird.f32 %v1030_v14 }
 0x148   :  { %1035 = vrcp.f32 %v1202_v15  ;;  %v418_v19 = vsel %vm415_vm13, %v417_v16, %v413_v18  ;;  %vm427_vm0 = vmor %vm425_vm15, %vm426_vm14  ;;  %v444_v43 = vand.u32 2147483647, %v1202_v15  ;;  %v446_v47 = vand.u32 2147483648, %v1202_v15 }
 0x149   :  { %v422_v20 = vsub.f32 1.0, %v421_v17  ;;  %v714_v21 = vmul.f32 %v418_v19, %v418_v19  ;;  %1037 = vrcp.f32 %v1200_v13  ;;  %v1032_v28 = vpop.eup %1031  ;;  %vm440_vm4 = vweird.f32 %v1202_v15 }
 0x14a   :  { %v286_v22 = vpop.f32.mrf.mxu1  ;;  %v1212_v32 = vadd.f32 1.0, %v1032_v28  ;;  %vm1234_vm5 = vcmp.eq.f32.partialorder %v444_v43, 8.507059e+37  ;;  %v447_v59 = vor.u32 1.1754944e-38, %v446_v47 }
 0x14b   :  { %v287_v25 = vadd.f32 %v1171_v7, %v286_v22  ;;  %v423_v26 = vmul.f32 %v1030_v14, %v422_v20  ;;  %v734_v27 = vsel %vm237_vm1, %v714_v21, 0.0 }
 0x14c   :  { %735 = vadd.xlane.f32.xlu1 %v734_v27  ;;  %vm605_vm8 = vweird.f32 %v1212_v32  ;;  %v611_v1 = vand.u32 2147483648, %v1212_v32 }
 0x14d   :  { %v1034_v29 = vpop.eup %1033  ;;  %v958_v30 = vmul.f32 -1.442695, %v287_v25  ;;  %v424_v31 = vadd.f32 %v1030_v14, %v423_v26  ;;  %v609_v26 = vand.u32 2147483647, %v1212_v32 }
 0x14e   :  { %v1036_v33 = vpop.eup %1035  ;;  %v1214_v34 = vadd.f32 1.0, %v1034_v29 }
 0x14f   :  { %v1216_v36 = vpop.eup %1037  ;;  %1039 = vpow2.f32 %v958_v30  ;;  %v428_v37 = vsel %vm427_vm0, %v1030_v14, %v424_v31  ;;  %v436_v46 = vmul.f32 %v1036_v33, %v1202_v15  ;;  %vm441_vm6 = vweird.f32 %v1036_v33 }
 0x150   :  { %1041 = vrcp.f32 %v1214_v34  ;;  %v433_v38 = vsel %vm430_vm2, %v432_v35, %v428_v37  ;;  %v586_v39 = vmul.f32 %v1216_v36, %v1200_v13  ;;  %vm591_vm7 = vweird.f32 %v1216_v36  ;;  %vm442_vm9 = vmor %vm440_vm4, %vm441_vm6 }
 0x151   :  { %v616_v41 = vpack.c.bf16 %v433_v38, %v418_v19  ;;  %v715_v42 = vmul.f32 %v433_v38, %v433_v38  ;;  %1043 = vrcp.f32 %v1212_v32  ;;  %v437_v50 = vsub.f32 1.0, %v436_v46  ;;  %vm1256_vm10 = vmor %vm590_vm3, %vm591_vm7 }
 0x152   :  { %v587_v44 = vsub.f32 1.0, %v586_v39  ;;  %v288_v45 = vpop.f32.mrf.mxu1  ;;  %v459_v0 = vand.u32 2147483647, %v1214_v34  ;;  %v461_v3 = vand.u32 2147483648, %v1214_v34  ;;  %vm455_vm11 = vweird.f32 %v1214_v34 }
 0x153   :  { %v289_v48 = vadd.f32 %v1171_v7, %v288_v45  ;;  %977 = vmatmul.msk.bf16.gmra.mxu2 %vm237_vm1, %v616_v41  ;;  %v737_v49 = vsel %vm237_vm1, %v715_v42, 0.0  ;;  %v438_v58 = vmul.f32 %v1036_v33, %v437_v50  ;;  %v594_v14 = vand.u32 2147483647, %v1200_v13 }
 0x154   :  { %738 = vadd.xlane.f32.xlu1 %v737_v49  ;;  %v588_v52 = vmul.f32 %v1216_v36, %v587_v44  ;;  %vm1267_vm14 = vcmp.eq.f32.partialorder %v459_v0, 8.507059e+37  ;;  %v462_v21 = vor.u32 1.1754944e-38, %v461_v3  ;;  %v612_v30 = vor.u32 1.1754944e-38, %v611_v1 }
 0x155   :  { %v1040_v51 = vpop.eup %1039  ;;  %v959_v54 = vmul.f32 -1.442695, %v289_v48  ;;  %v439_v63 = vadd.f32 %v1036_v33, %v438_v58  ;;  %vm595_vm2 = vcmp.eq.f32.partialorder %v594_v14, 8.507059e+37  ;;  %vm610_vm3 = vcmp.eq.f32.partialorder %v609_v26, 8.507059e+37 }
 0x156   :  { %v1042_v56 = vpop.eup %1041  ;;  %v1238_v57 = vadd.f32 1.0, %v1040_v51  ;;  %v589_v4 = vadd.f32 %v1216_v36, %v588_v52 }
 0x157   :  { %v1240_v60 = vpop.eup %1043  ;;  %v451_v61 = vmul.f32 %v1042_v56, %v1214_v34  ;;  %1045 = vpow2.f32 %v959_v54  ;;  %v443_v9 = vsel %vm442_vm9, %v1036_v33, %v439_v63  ;;  %vm456_vm12 = vweird.f32 %v1042_v56 }
 0x158   :  { %1047 = vrcp.f32 %v1238_v57  ;;  %v601_v62 = vmul.f32 %v1240_v60, %v1212_v32  ;;  %v448_v11 = vsel %vm1234_vm5, %v447_v59, %v443_v9  ;;  %vm606_vm13 = vweird.f32 %v1240_v60  ;;  %vm457_vm15 = vmor %vm455_vm11, %vm456_vm12 }
 0x159   :  { %v452_v2 = vsub.f32 1.0, %v451_v61  ;;  %v716_v17 = vmul.f32 %v448_v11, %v448_v11  ;;  %v593_v22 = vsel %vm1256_vm10, %v1216_v36, %v589_v4  ;;  %vm1284_vm0 = vmor %vm605_vm8, %vm606_vm13  ;;  %v474_v32 = vand.u32 2147483647, %v1238_v57 }
 0x15a   :  { %v602_v6 = vsub.f32 1.0, %v601_v62  ;;  %v291_v8 = vpop.f32.mrf.mxu1  ;;  %v476_v37 = vand.u32 2147483648, %v1238_v57  ;;  %v1295_v38 = vsel %vm595_vm2, %v1232_v53, %v593_v22  ;;  %vm470_vm5 = vweird.f32 %v1238_v57 }
 0x15b   :  { %v292_v10 = vadd.f32 %v1171_v7, %v291_v8  ;;  %v453_v12 = vmul.f32 %v1042_v56, %v452_v2  ;;  %v740_v13 = vsel %vm237_vm1, %v716_v17, 0.0  ;;  %vm475_vm7 = vcmp.eq.f32.partialorder %v474_v32, 8.507059e+37 }
 0x15c   :  { %v603_v15 = vmul.f32 %v1240_v60, %v602_v6  ;;  %741 = vadd.xlane.f32.xlu2 %v740_v13  ;;  %v477_v50 = vor.u32 1.1754944e-38, %v476_v37 }
 0x15d   :  { %v1046_v18 = vpop.eup %1045  ;;  %v960_v19 = vmul.f32 -1.442695, %v292_v10  ;;  %v454_v20 = vadd.f32 %v1042_v56, %v453_v12 }
 0x15e   :  { %v1048_v23 = vpop.eup %1047  ;;  %v1274_v24 = vadd.f32 1.0, %v1046_v18  ;;  %v604_v25 = vadd.f32 %v1240_v60, %v603_v15 }
 0x15f   :  { %1049 = vpow2.f32 %v960_v19  ;;  %v458_v28 = vsel %vm457_vm15, %v1042_v56, %v454_v20  ;;  %v466_v29 = vmul.f32 %v1048_v23, %v1238_v57  ;;  %vm471_vm4 = vweird.f32 %v1048_v23 }
 0x160   :  { %1051 = vrcp.f32 %v1274_v24  ;;  %v463_v31 = vsel %vm1267_vm14, %v462_v21, %v458_v28  ;;  %v608_v39 = vsel %vm1284_vm0, %v1240_v60, %v604_v25  ;;  %vm472_vm6 = vmor %vm470_vm5, %vm471_vm4  ;;  %v489_v57 = vand.u32 2147483647, %v1274_v24 }
 0x161   :  { %v617_v33 = vpack.c.bf16 %v463_v31, %v448_v11  ;;  %v717_v34 = vmul.f32 %v463_v31, %v463_v31  ;;  %v467_v35 = vsub.f32 1.0, %v466_v29  ;;  %v1303_v43 = vsel %vm610_vm3, %v612_v30, %v608_v39 }
 0x162   :  { %v293_v36 = vpop.f32.mrf.mxu1  ;;  %v622_v47 = vpack.c.bf16 %v1303_v43, %v1295_v38  ;;  %v491_v58 = vand.u32 2147483648, %v1274_v24  ;;  %vm485_vm9 = vweird.f32 %v1274_v24  ;;  %vm490_vm11 = vcmp.eq.f32.partialorder %v489_v57, 8.507059e+37 }
 0x163   :  { %v294_v40 = vadd.f32 %v1171_v7, %v293_v36  ;;  %978 = vmatmul.msk.bf16.gmra.mxu2 %vm237_vm1, %v617_v33  ;;  %v743_v41 = vsel %vm237_vm1, %v717_v34, 0.0  ;;  %v468_v42 = vmul.f32 %v1048_v23, %v467_v35 }
 0x164   :  { %744 = vadd.xlane.f32.xlu0 %v743_v41  ;;  %983 = vmatmul.msk.bf16.vlgmr.msra.gmra.mxu3 %vm237_vm1, %v622_v47  ;;  %v492_v3 = vor.u32 1.1754944e-38, %v491_v58 }
 0x165   :  { %v1050_v44 = vpop.eup %1049  ;;  %v961_v45 = vmul.f32 -1.442695, %v294_v40  ;;  %v469_v46 = vadd.f32 %v1048_v23, %v468_v42 }
 0x166   :  { %v1052_v48 = vpop.eup %1051  ;;  %v367_v49 = vadd.f32 1.0, %v1050_v44 }
 0x167   :  { %v481_v51 = vmul.f32 %v1052_v48, %v1274_v24  ;;  %1053 = vpow2.f32 %v961_v45  ;;  %v473_v52 = vsel %vm472_vm6, %v1048_v23, %v469_v46  ;;  %vm486_vm8 = vweird.f32 %v1052_v48 }
 0x168   :  { %1055 = vrcp.f32 %v367_v49  ;;  %v478_v53 = vsel %vm475_vm7, %v477_v50, %v473_v52  ;;  %vm487_vm10 = vmor %vm485_vm9, %vm486_vm8  ;;  %v506_v11 = vand.u32 2147483648, %v367_v49  ;;  %v504_v15 = vand.u32 2147483647, %v367_v49 }
 0x169   :  { %v718_v54 = vmul.f32 %v478_v53, %v478_v53  ;;  %v482_v55 = vsub.f32 1.0, %v481_v51  ;;  %vm500_vm13 = vweird.f32 %v367_v49 }
 0x16a   :  { %v296_v56 = vpop.f32.mrf.mxu1  ;;  %v507_v21 = vor.u32 1.1754944e-38, %v506_v11  ;;  %vm505_vm15 = vcmp.eq.f32.partialorder %v504_v15, 8.507059e+37 }
 0x16b   :  { %v297_v59 = vadd.f32 %v1171_v7, %v296_v56  ;;  %v746_v60 = vsel %vm237_vm1, %v718_v54, 0.0  ;;  %v483_v61 = vmul.f32 %v1052_v48, %v482_v55 }
 0x16c   :  { %747 = vadd.xlane.f32.xlu0 %v746_v60 }
 0x16d   :  { %v1054_v62 = vpop.eup %1053  ;;  %v962_v63 = vmul.f32 -1.442695, %v297_v59  ;;  %v484_v0 = vadd.f32 %v1052_v48, %v483_v61 }
 0x16e   :  { %v1056_v1 = vpop.eup %1055  ;;  %v368_v2 = vadd.f32 1.0, %v1054_v62 }
 0x16f   :  { %1057 = vpow2.f32 %v962_v63  ;;  %v488_v4 = vsel %vm487_vm10, %v1052_v48, %v484_v0  ;;  %v496_v5 = vmul.f32 %v1056_v1, %v367_v49  ;;  %vm501_vm12 = vweird.f32 %v1056_v1 }
 0x170   :  { %1059 = vrcp.f32 %v368_v2  ;;  %v1315_v6 = vsel %vm490_vm11, %v492_v3, %v488_v4  ;;  %vm502_vm14 = vmor %vm500_vm13, %vm501_vm12  ;;  %v519_v27 = vand.u32 2147483647, %v368_v2  ;;  %v521_v28 = vand.u32 2147483648, %v368_v2 }
 0x171   :  { %v618_v8 = vpack.c.bf16 %v1315_v6, %v478_v53  ;;  %v497_v9 = vsub.f32 1.0, %v496_v5  ;;  %vm515_vm2 = vweird.f32 %v368_v2 }
 0x172   :  { %v298_v10 = vpop.f32.mrf.mxu1  ;;  %v522_v37 = vor.u32 1.1754944e-38, %v521_v28  ;;  %vm520_vm4 = vcmp.eq.f32.partialorder %v519_v27, 8.507059e+37 }
 0x173   :  { %v299_v12 = vadd.f32 %v1171_v7, %v298_v10  ;;  %979 = vmatmul.msk.bf16.gmra.mxu2 %vm237_vm1, %v618_v8  ;;  %v498_v14 = vmul.f32 %v1056_v1, %v497_v9  ;;  %v727_v9 = vmul.f32 %v1303_v43, %v1303_v43 }
 0x175   :  { %v1058_v16 = vpop.eup %1057  ;;  %v963_v17 = vmul.f32 -1.442695, %v299_v12  ;;  %v499_v18 = vadd.f32 %v1056_v1, %v498_v14 }
 0x176   :  { %v1060_v19 = vpop.eup %1059  ;;  %v369_v20 = vadd.f32 1.0, %v1058_v16 }
 0x177   :  { %v511_v22 = vmul.f32 %v1060_v19, %v368_v2  ;;  %1061 = vpow2.f32 %v963_v17  ;;  %v503_v23 = vsel %vm502_vm14, %v1056_v1, %v499_v18  ;;  %vm516_vm0 = vweird.f32 %v1060_v19 }
 0x178   :  { %1063 = vrcp.f32 %v369_v20  ;;  %v508_v24 = vsel %vm505_vm15, %v507_v21, %v503_v23  ;;  %vm517_vm3 = vmor %vm515_vm2, %vm516_vm0  ;;  %v534_v47 = vand.u32 2147483647, %v369_v20  ;;  %v536_v48 = vand.u32 2147483648, %v369_v20 }
 0x179   :  { %v720_v13 = vmul.f32 %v508_v24, %v508_v24  ;;  %v512_v25 = vsub.f32 1.0, %v511_v22  ;;  %vm530_vm6 = vweird.f32 %v369_v20  ;;  %v773_v17 = vsel %vm237_vm1, %v727_v9, 0.0 }
 0x17a   :  { %v301_v26 = vpop.f32.mrf.mxu1  ;;  %v537_v57 = vor.u32 1.1754944e-38, %v536_v48  ;;  %vm535_vm8 = vcmp.eq.f32.partialorder %v534_v47, 8.507059e+37 }
 0x17b   :  { %v302_v29 = vadd.f32 %v1171_v7, %v301_v26  ;;  %v752_v30 = vsel %vm237_vm1, %v720_v13, 0.0  ;;  %v513_v31 = vmul.f32 %v1060_v19, %v512_v25 }
 0x17c   :  { %753 = vadd.xlane.f32.xlu2 %v752_v30 }
 0x17d   :  { %v1062_v33 = vpop.eup %1061  ;;  %v964_v34 = vmul.f32 -1.442695, %v302_v29  ;;  %v514_v35 = vadd.f32 %v1060_v19, %v513_v31 }
 0x17e   :  { %v1064_v32 = vpop.eup %1063  ;;  %v370_v36 = vadd.f32 1.0, %v1062_v33 }
 0x17f   :  { %1065 = vpow2.f32 %v964_v34  ;;  %v518_v39 = vsel %vm517_vm3, %v1060_v19, %v514_v35  ;;  %v526_v40 = vmul.f32 %v1064_v32, %v369_v20  ;;  %vm531_vm5 = vweird.f32 %v1064_v32 }
 0x180   :  { %1067 = vrcp.f32 %v370_v36  ;;  %v523_v41 = vsel %vm520_vm4, %v522_v37, %v518_v39  ;;  %vm532_vm7 = vmor %vm530_vm6, %vm531_vm5  ;;  %v551_v62 = vand.u32 2147483648, %v370_v36  ;;  %v549_v1 = vand.u32 2147483647, %v370_v36 }
 0x181   :  { %v619_v42 = vpack.c.bf16 %v523_v41, %v508_v24  ;;  %v721_v44 = vmul.f32 %v523_v41, %v523_v41  ;;  %v527_v45 = vsub.f32 1.0, %v526_v40  ;;  %vm545_vm10 = vweird.f32 %v370_v36 }
 0x182   :  { %v303_v46 = vpop.f32.mrf.mxu1  ;;  %v552_v8 = vor.u32 1.1754944e-38, %v551_v62  ;;  %vm550_vm12 = vcmp.eq.f32.partialorder %v549_v1, 8.507059e+37 }
 0x183   :  { %v304_v49 = vadd.f32 %v1171_v7, %v303_v46  ;;  %980 = vmatmul.msk.bf16.gmra.mxu2 %vm237_vm1, %v619_v42  ;;  %v755_v50 = vsel %vm237_vm1, %v721_v44, 0.0  ;;  %v528_v51 = vmul.f32 %v1064_v32, %v527_v45  ;;  %v726_v42 = vmul.f32 %v1295_v38, %v1295_v38 }
 0x184   :  { %756 = vadd.xlane.f32.xlu2 %v755_v50 }
 0x185   :  { %v1066_v52 = vpop.eup %1065  ;;  %v965_v53 = vmul.f32 -1.442695, %v304_v49  ;;  %v529_v54 = vadd.f32 %v1064_v32, %v528_v51  ;;  %v770_v44 = vsel %vm237_vm1, %v726_v42, 0.0  ;;  %v1343_v49 = vld [vmem:[%s1370_s6] ss:$0 sm:$0xff] }
 0x186   :  { %v1068_v55 = vpop.eup %1067  ;;  %v371_v56 = vadd.f32 1.0, %v1066_v52 }
 0x187   :  { %v541_v58 = vmul.f32 %v1068_v55, %v370_v36  ;;  %1069 = vpow2.f32 %v965_v53  ;;  %v533_v59 = vsel %vm532_vm7, %v1064_v32, %v529_v54  ;;  %vm546_vm9 = vweird.f32 %v1068_v55 }
 0x188   :  { %1071 = vrcp.f32 %v371_v56  ;;  %v538_v7 = vsel %vm535_vm8, %v537_v57, %v533_v59  ;;  %vm547_vm11 = vmor %vm545_vm10, %vm546_vm9  ;;  %v566_v18 = vand.u32 2147483648, %v371_v56  ;;  %v564_v21 = vand.u32 2147483647, %v371_v56 }
 0x189   :  { %v722_v60 = vmul.f32 %v538_v7, %v538_v7  ;;  %v542_v61 = vsub.f32 1.0, %v541_v58  ;;  %vm560_vm14 = vweird.f32 %v371_v56  ;;  %v719_v32 = vmul.f32 %v1315_v6, %v1315_v6 }
 0x18a   :  { %v567_v23 = vor.u32 1.1754944e-38, %v566_v18  ;;  %vm565_vm0 = vcmp.eq.f32.partialorder %v564_v21, 8.507059e+37 }
 0x18b   :  { %v758_v63 = vsel %vm237_vm1, %v722_v60, 0.0  ;;  %v543_v0 = vmul.f32 %v1068_v55, %v542_v61  ;;  %v749_v41 = vsel %vm237_vm1, %v719_v32, 0.0 }
 0x18c   :  { %759 = vadd.xlane.f32.xlu0 %v758_v63 }
 0x18d   :  { %v1070_v2 = vpop.eup %1069  ;;  %v544_v3 = vadd.f32 %v1068_v55, %v543_v0 }
 0x18e   :  { %v1072_v4 = vpop.eup %1071  ;;  %v372_v5 = vadd.f32 1.0, %v1070_v2 }
 0x18f   :  { %v548_v10 = vsel %vm547_vm11, %v1068_v55, %v544_v3  ;;  %v556_v11 = vmul.f32 %v1072_v4, %v371_v56  ;;  %vm561_vm13 = vweird.f32 %v1072_v4 }
 0x190   :  { %1073 = vrcp.f32 %v372_v5  ;;  %v553_v12 = vsel %vm550_vm12, %v552_v8, %v548_v10  ;;  %vm562_vm15 = vmor %vm560_vm14, %vm561_vm13  ;;  %v581_v28 = vand.u32 2147483648, %v372_v5  ;;  %v579_v31 = vand.u32 2147483647, %v372_v5 }
 0x191   :  { %v620_v14 = vpack.c.bf16 %v553_v12, %v538_v7  ;;  %v723_v15 = vmul.f32 %v553_v12, %v553_v12  ;;  %v557_v16 = vsub.f32 1.0, %v556_v11  ;;  %vm575_vm3 = vweird.f32 %v372_v5 }
 0x192   :  { %v582_v34 = vor.u32 1.1754944e-38, %v581_v28  ;;  %vm580_vm5 = vcmp.eq.f32.partialorder %v579_v31, 8.507059e+37 }
 0x193   :  { %981 = vmatmul.msk.bf16.gmra.mxu2 %vm237_vm1, %v620_v14  ;;  %v761_v19 = vsel %vm237_vm1, %v723_v15, 0.0  ;;  %v558_v20 = vmul.f32 %v1072_v4, %v557_v16 }
 0x194   :  { %762 = vadd.xlane.f32.xlu1 %v761_v19  ;;  %774 = vadd.xlane.f32.xlu0 %v773_v17 }
 0x195   :  { %v559_v43 = vadd.f32 %v1072_v4, %v558_v20 }
 0x196   :  { %v1074_v22 = vpop.eup %1073 }
 0x197   :  { %v571_v24 = vmul.f32 %v1074_v22, %v372_v5  ;;  %v563_v13 = vsel %vm562_vm15, %v1072_v4, %v559_v43  ;;  %vm576_vm2 = vweird.f32 %v1074_v22 }
 0x198   :  { %v568_v25 = vsel %vm565_vm0, %v567_v23, %v563_v13  ;;  %vm577_vm4 = vmor %vm575_vm3, %vm576_vm2 }
 0x199   :  { %v724_v26 = vmul.f32 %v568_v25, %v568_v25  ;;  %v572_v27 = vsub.f32 1.0, %v571_v24 }
 0x19b   :  { %v764_v29 = vsel %vm237_vm1, %v724_v26, 0.0  ;;  %v573_v30 = vmul.f32 %v1074_v22, %v572_v27 }
 0x19c   :  { %765 = vadd.xlane.f32.xlu1 %v764_v29 }
 0x19d   :  { %v574_v33 = vadd.f32 %v1074_v22, %v573_v30 }
 0x19f   :  { %v578_v35 = vsel %vm577_vm4, %v1074_v22, %v574_v33 }
 0x1a0   :  { %v583_v36 = vsel %vm580_vm5, %v582_v34, %v578_v35 }
 0x1a1   :  { %v621_v37 = vpack.c.bf16 %v583_v36, %v568_v25  ;;  %v725_v39 = vmul.f32 %v583_v36, %v583_v36 }
 0x1a3   :  { %982 = vmatmul.msk.bf16.gmra.mxu2 %vm237_vm1, %v621_v37  ;;  %v767_v40 = vsel %vm237_vm1, %v725_v39, 0.0  ;;  %vm872_vm1 = vcmask 1041409  }
 0x1a4   :  { %768 = vadd.xlane.f32.xlu2 %v767_v40  ;;  %750 = vadd.xlane.f32.xlu1 %v749_v41 }
 0x1ac   :  { %771 = vadd.xlane.f32.xlu2 %v770_v44 }
 0x1af   :  { %v730_v47 = vpop.xlane.xlu0 %729 }
 0x1b7   :  { %v733_v56 = vpop.xlane.xlu0 %732 }
 0x1bf   :  { %v736_v50 = vpop.xlane.xlu1 %735 }
 0x1c6   :  { %v672_v45 = vpop.f32.mrf.mxu2 }
 0x1c7   :  { %v776_v6 = vmul.f32 2.0, %v672_v45  ;;  %v739_v62 = vpop.xlane.xlu1 %738 }
 0x1c9   :  { %v792_v48 = vsub.f32 %v730_v47, %v776_v6 }
 0x1cb   :  { %v812_v53 = vadd.f32 %v1343_v49, %v792_v48 }
 0x1cd   :  { %v828_v57 = vmax.f32 %v812_v53, 0.0 }
 0x1ce   :  { %v674_v46 = vpop.f32.mrf.mxu2 }
 0x1cf   :  { %v777_v54 = vmul.f32 2.0, %v674_v46  ;;  %v742_v9 = vpop.xlane.xlu2 %741 }
 0x1d1   :  { %v793_v58 = vsub.f32 %v733_v56, %v777_v54 }
 0x1d3   :  { %v813_v63 = vadd.f32 %v1343_v49, %v793_v58 }
 0x1d5   :  { %v829_v2 = vmax.f32 %v813_v63, 0.0 }
 0x1d6   :  { %v677_v51 = vpop.f32.mrf.mxu2 }
 0x1d7   :  { %v778_v52 = vmul.f32 2.0, %v677_v51  ;;  %v745_v17 = vpop.xlane.xlu0 %744 }
 0x1d9   :  { %v794_v38 = vsub.f32 %v736_v50, %v778_v52 }
 0x1db   :  { %v814_v55 = vadd.f32 %v1343_v49, %v794_v38 }
 0x1dd   :  { %v830_v59 = vmax.f32 %v814_v55, 0.0 }
 0x1de   :  { %v679_v7 = vpop.f32.mrf.mxu2 }
 0x1df   :  { %v844_v60 = vmin.f32 %v828_v57, %v830_v59  ;;  %v779_v61 = vmul.f32 2.0, %v679_v7  ;;  %v748_v28 = vpop.xlane.xlu0 %747 }
 0x1e1   :  { %v795_v0 = vsub.f32 %v739_v62, %v779_v61 }
 0x1e3   :  { %v815_v1 = vadd.f32 %v1343_v49, %v795_v0 }
 0x1e5   :  { %v831_v3 = vmax.f32 %v815_v1, 0.0 }
 0x1e6   :  { %v682_v4 = vpop.f32.mrf.mxu2 }
 0x1e7   :  { %v845_v5 = vmin.f32 %v829_v2, %v831_v3  ;;  %v780_v8 = vmul.f32 2.0, %v682_v4  ;;  %v707_v40 = vpop.f32.mrf.mxu3 }
 0x1e8   :  { %v790_v62 = vmul.f32 2.0, %v707_v40 }
 0x1e9   :  { %v796_v10 = vsub.f32 %v742_v9, %v780_v8 }
 0x1eb   :  { %v816_v11 = vadd.f32 %v1343_v49, %v796_v10 }
 0x1ed   :  { %v832_v12 = vmax.f32 %v816_v11, 0.0 }
 0x1ee   :  { %v684_v14 = vpop.f32.mrf.mxu2 }
 0x1ef   :  { %v846_v15 = vmin.f32 %v844_v60, %v832_v12  ;;  %v781_v16 = vmul.f32 2.0, %v684_v14  ;;  %v754_v27 = vpop.xlane.xlu2 %753  ;;  %v709_v53 = vpop.f32.mrf.mxu3 }
 0x1f0   :  { %v791_v58 = vmul.f32 2.0, %v709_v53 }
 0x1f1   :  { %v797_v18 = vsub.f32 %v745_v17, %v781_v16 }
 0x1f3   :  { %v817_v19 = vadd.f32 %v1343_v49, %v797_v18 }
 0x1f5   :  { %v833_v20 = vmax.f32 %v817_v19, 0.0 }
 0x1f6   :  { %v687_v21 = vpop.f32.mrf.mxu2 }
 0x1f7   :  { %v847_v43 = vmin.f32 %v845_v5, %v833_v20  ;;  %v782_v13 = vmul.f32 2.0, %v687_v21  ;;  %v757_v36 = vpop.xlane.xlu2 %756 }
 0x1f9   :  { %v798_v29 = vsub.f32 %v748_v28, %v782_v13 }
 0x1fb   :  { %v818_v30 = vadd.f32 %v1343_v49, %v798_v29 }
 0x1fd   :  { %v834_v32 = vmax.f32 %v818_v30, 0.0 }
 0x1fe   :  { %v689_v22 = vpop.f32.mrf.mxu2 }
 0x1ff   :  { %v783_v31 = vmul.f32 2.0, %v689_v22  ;;  %v848_v41 = vmin.f32 %v846_v15, %v834_v32  ;;  %v760_v46 = vpop.xlane.xlu0 %759 }
 0x206   :  { %v692_v23 = vpop.f32.mrf.mxu2 }
 0x207   :  { %v763_v24 = vpop.xlane.xlu1 %762  ;;  %v784_v48 = vmul.f32 2.0, %v692_v23  ;;  %v775_v7 = vpop.xlane.xlu0 %774 }
 0x208   :  { %v807_v2 = vsub.f32 %v775_v7, %v791_v58 }
 0x209   :  { %v800_v55 = vsub.f32 %v754_v27, %v784_v48 }
 0x20a   :  { %v827_v15 = vadd.f32 %v1343_v49, %v807_v2 }
 0x20b   :  { %v820_v63 = vadd.f32 %v1343_v49, %v800_v55 }
 0x20c   :  { %v843_v23 = vmax.f32 %v827_v15, 0.0 }
 0x20d   :  { %v836_v10 = vmax.f32 %v820_v63, 0.0 }
 0x20e   :  { %v694_v25 = vpop.f32.mrf.mxu2 }
 0x20f   :  { %v766_v26 = vpop.xlane.xlu1 %765  ;;  %v785_v51 = vmul.f32 2.0, %v694_v25 }
 0x211   :  { %v801_v59 = vsub.f32 %v757_v36, %v785_v51 }
 0x213   :  { %v821_v3 = vadd.f32 %v1343_v49, %v801_v59 }
 0x215   :  { %v837_v16 = vmax.f32 %v821_v3, 0.0 }
 0x216   :  { %v697_v33 = vpop.f32.mrf.mxu2 }
 0x217   :  { %v751_v34 = vpop.xlane.xlu1 %750  ;;  %v769_v6 = vpop.xlane.xlu2 %768  ;;  %v786_v47 = vmul.f32 2.0, %v697_v33 }
 0x218   :  { %v799_v35 = vsub.f32 %v751_v34, %v783_v31 }
 0x219   :  { %v802_v54 = vsub.f32 %v760_v46, %v786_v47 }
 0x21a   :  { %v819_v37 = vadd.f32 %v1343_v49, %v799_v35 }
 0x21b   :  { %v822_v60 = vadd.f32 %v1343_v49, %v802_v54 }
 0x21c   :  { %v835_v39 = vmax.f32 %v819_v37, 0.0 }
 0x21d   :  { %v838_v5 = vmax.f32 %v822_v60, 0.0 }
 0x21e   :  { %v849_v42 = vmin.f32 %v847_v43, %v835_v39  ;;  %v699_v44 = vpop.f32.mrf.mxu2 }
 0x21f   :  { %v787_v50 = vmul.f32 2.0, %v699_v44  ;;  %v772_v61 = vpop.xlane.xlu2 %771  ;;  %v857_v17 = vmin.f32 %v836_v10, %v838_v5 }
 0x220   :  { %v850_v45 = vmin.f32 %v848_v41, %v849_v42  ;;  %v806_v8 = vsub.f32 %v772_v61, %v790_v62 }
 0x221   :  { %v803_v56 = vsub.f32 %v763_v24, %v787_v50 }
 0x222   :  { %v851_v18 = vrot.slane %v850_v45, 4  ;;  %v826_v19 = vadd.f32 %v1343_v49, %v806_v8 }
 0x223   :  { %v823_v0 = vadd.f32 %v1343_v49, %v803_v56 }
 0x224   :  { %v852_v24 = vmin.f32 %v850_v45, %v851_v18  ;;  %v842_v13 = vmax.f32 %v826_v19, 0.0 }
 0x225   :  { %v839_v11 = vmax.f32 %v823_v0, 0.0 }
 0x226   :  { %v702_v52 = vpop.f32.mrf.mxu2  ;;  %v853_v28 = vrot.slane %v852_v24, 2 }
 0x227   :  { %v788_v38 = vmul.f32 2.0, %v702_v52  ;;  %v858_v21 = vmin.f32 %v837_v16, %v839_v11 }
 0x228   :  { %v854_v31 = vmin.f32 %v852_v24, %v853_v28 }
 0x229   :  { %v804_v57 = vsub.f32 %v766_v26, %v788_v38 }
 0x22a   :  { %v855_v35 = vrot.slane %v854_v31, 1 }
 0x22b   :  { %v824_v1 = vadd.f32 %v1343_v49, %v804_v57 }
 0x22d   :  { %v840_v12 = vmax.f32 %v824_v1, 0.0 }
 0x22e   :  { %v704_v4 = vpop.f32.mrf.mxu2 }
 0x22f   :  { %v789_v9 = vmul.f32 2.0, %v704_v4  ;;  %v859_v43 = vmin.f32 %v857_v17, %v840_v12 }
 0x231   :  { %v805_v14 = vsub.f32 %v769_v6, %v789_v9  ;;  %v861_v26 = vmin.f32 %v859_v43, %v842_v13 }
 0x233   :  { %v825_v20 = vadd.f32 %v1343_v49, %v805_v14  ;;  %v856_v49 = vmin.f32 %v854_v31, %v855_v35 }
 0x235   :  { %v841_v22 = vmax.f32 %v825_v20, 0.0 }
 0x237   :  { %v860_v25 = vmin.f32 %v858_v21, %v841_v22 }
 0x239   :  { %v862_v27 = vmin.f32 %v860_v25, %v843_v23 }
 0x23b   :  { %v863_v29 = vmin.f32 %v861_v26, %v862_v27 }
 0x23d   :  { %v864_v30 = vrot.slane %v863_v29, 4 }
 0x23f   :  { %v865_v33 = vmin.f32 %v863_v29, %v864_v30 }
 0x241   :  { %v866_v34 = vrot.slane %v865_v33, 2 }
 0x243   :  { %v867_v32 = vmin.f32 %v865_v33, %v866_v34 }
 0x245   :  { %v868_v36 = vrot.slane %v867_v32, 1 }
 0x247   :  { %v869_v37 = vmin.f32 %v867_v32, %v868_v36 }
 0x249   :  { %v873_v39 = vsel %vm872_vm1, %v869_v37, %v856_v49 }
 0x24a   :  { %875 = vst [vmem:[%s1371_s7] sm:$0x3] %v873_v39 }

</bundles_post_ra>
